<compile_context>
chip_gen: v7x
topology: tpu7x:2x2x1
jax: 0.10.0
libtpu: 0.0.40
codegen_flags: <defaults>
</compile_context>

<pallas_src>
import jax
import jax.numpy as jnp
from jax import lax
from jax.experimental import pallas as pl
from jax.experimental.pallas import tpu as pltpu


def _round_up(x: int, m: int) -> int:
    return (x + m - 1) // m * m


def _vmem_budget_bytes() -> int:
    """Usable VMEM budget with headroom for Mosaic internal scratch."""
    try:
        cap = int(pltpu.get_tpu_info().vmem_capacity_bytes)
    except Exception:
        cap = 64 * 1024 * 1024  # conservative default (v7x per-TC VMEM)
    # TODO(synk): on v7x verify whether this is per-TensorCore or per-chip.
    return int(cap * 0.7)


def _pick_tile(n_tok: int, max_tile: int, sub: int) -> int:
    """Token tile size: multiple of the sublane packing, prefer divisors of
    n_tok so no padding (and no post-kernel slice copy) is needed."""
    max_tile = max(sub, _round_up(max_tile, sub))
    if n_tok <= max_tile:
        return _round_up(n_tok, sub)
    t = max_tile
    while t >= max(64, sub):
        if n_tok % t == 0:
            return t
        t -= sub
    return max_tile


# --------------------------------------------------------------------------
# Path 1: small vocabulary -> one-hot matmul on the MXU, table VMEM-resident.
# --------------------------------------------------------------------------
def _onehot_embed_kernel(ids_ref, table_ref, out_ref):
    tile = out_ref.shape[0]
    vocab = table_ref.shape[0]
    ids = ids_ref[...]                                         # (tile, 1) int32
    iota = lax.broadcasted_iota(jnp.int32, (tile, vocab), 1)   # (tile, V)
    one_hot = (ids == iota).astype(table_ref.dtype)
    out_ref[...] = jnp.dot(
        one_hot, table_ref[...], preferred_element_type=jnp.float32
    ).astype(out_ref.dtype)


def _embed_onehot(flat_ids, table, tile, n_tiles, vmem_limit):
    n_pad = n_tiles * tile
    vocab, d_model = table.shape
    return pl.pallas_call(
        _onehot_embed_kernel,
        out_shape=jax.ShapeDtypeStruct((n_pad, d_model), table.dtype),
        grid=(n_tiles,),
        in_specs=[
            pl.BlockSpec((tile, 1), lambda i: (i, 0)),          # ids tile (VMEM)
            # Whole table resident in VMEM, constant index map.
            # TODO(synk): pipeline_mode=pl.Buffered(1) would single-buffer it.
            pl.BlockSpec((vocab, d_model), lambda i: (0, 0)),
        ],
        out_specs=pl.BlockSpec((tile, d_model), lambda i: (i, 0)),
        compiler_params=pltpu.CompilerParams(
            dimension_semantics=("parallel",),
            vmem_limit_bytes=vmem_limit,
        ),
    )(flat_ids.reshape(n_pad, 1), table)


# --------------------------------------------------------------------------
# Path 2: general case -> table stays in HBM, row-granular async-DMA gather.
# --------------------------------------------------------------------------
_NBUF = 8  # row DMAs in flight per group (2 groups outstanding)


def _hbm_gather_kernel(ids_ref, table_ref, out_ref, sem):
    tile = out_ref.shape[0]
    vocab = table_ref.shape[0]
    base = pl.program_id(0) * tile
    n_groups = tile // _NBUF

    def row_copy(t, slot, u):
        tok = ids_ref[base + t]                       # SMEM scalar read
        tok = jnp.minimum(jnp.maximum(tok, 0), vocab - 1)   # guard OOB DMA
        return pltpu.make_async_copy(
            table_ref.at[pl.ds(tok, 1), :],           # (1, D) row in HBM
            out_ref.at[pl.ds(t, 1), :],               # (1, D) row of out tile
            sem.at[slot, u])

    def issue(g):
        slot = g & 1
        for u in range(_NBUF):                        # statically unrolled group
            row_copy(g * _NBUF + u, slot, u).start()

    def drain(g):
        slot = g & 1
        for u in range(_NBUF):
            row_copy(g * _NBUF + u, slot, u).wait()

    issue(0)                                          # prime first group

    def body(g, carry):
        @pl.when(g + 1 < n_groups)
        def _():
            issue(g + 1)                              # keep next group in flight
        drain(g)
        return carry

    lax.fori_loop(0, n_groups, body, 0, unroll=False)


def _embed_hbm_gather(flat_ids, table, tile, n_tiles, vmem_limit):
    n_pad = n_tiles * tile
    _, d_model = table.shape
    return pl.pallas_call(
        _hbm_gather_kernel,
        out_shape=jax.ShapeDtypeStruct((n_pad, d_model), table.dtype),
        grid_spec=pltpu.PrefetchScalarGridSpec(
            # TODO(synk): for very long sequences (n_tok >> 1e5) chunk the id
            # prefetch / use per-tile SMEM blocks instead of one SMEM array.
            num_scalar_prefetch=1,                    # flat ids -> SMEM
            grid=(n_tiles,),
            in_specs=[pl.BlockSpec(memory_space=pl.ANY)],   # table stays in HBM
            out_specs=pl.BlockSpec((tile, d_model), lambda i, ids: (i, 0)),
            scratch_shapes=[pltpu.SemaphoreType.DMA((2, _NBUF))],
        ),
        compiler_params=pltpu.CompilerParams(
            dimension_semantics=("parallel",),
            vmem_limit_bytes=vmem_limit,
        ),
    )(flat_ids, table)


# --------------------------------------------------------------------------
# Wrapper: equivalent of nn.Embedding(vocab_size, d_model)(input_ids)
# --------------------------------------------------------------------------
def word_embedding(input_ids: jax.Array, emb_table: jax.Array, *,
                   max_tile: int = 512, max_onehot_vocab: int = 2048,
                   force_hbm_gather: bool = False) -> jax.Array:
    lead_shape = input_ids.shape
    n_tok = 1
    for s in lead_shape:
        n_tok *= int(s)
    vocab, d_model = emb_table.shape
    itemsize = jnp.dtype(emb_table.dtype).itemsize
    sub = max(8, 32 // itemsize)          # sublane packing: 8 f32 / 16 bf16 / 32 i8

    flat_ids = input_ids.reshape(-1)
    if flat_ids.dtype != jnp.int32:
        flat_ids = flat_ids.astype(jnp.int32)

    tile = _pick_tile(n_tok, max_tile, sub)
    n_tiles = -(-n_tok // tile)
    n_pad = n_tiles * tile
    if n_pad != n_tok:
        flat_ids = jnp.pad(flat_ids, (0, n_pad - n_tok))   # pad ids -> row 0

    budget = _vmem_budget_bytes()
    table_bytes = vocab * d_model * itemsize
    out_blk_bytes = tile * d_model * itemsize
    # Conservative: table possibly double-buffered, f32 one-hot temp, out blocks.
    mxu_needed = (2 * table_bytes + 2 * out_blk_bytes
                  + 2 * tile * vocab * 4 + tile * 8 + (2 << 20))

    use_mxu = ((not force_hbm_gather)
               and vocab <= max_onehot_vocab
               and mxu_needed <= budget)

    if use_mxu:
        out = _embed_onehot(flat_ids, emb_table, tile, n_tiles, budget)
    else:
        out = _embed_hbm_gather(flat_ids, emb_table, tile, n_tiles, budget)

    if n_pad != n_tok:
        out = out[:n_tok]
    return out.reshape(lead_shape + (d_model,))


if __name__ == "__main__":
    key = jax.random.PRNGKey(0)
    k_emb, k_ids = jax.random.split(key)

    vocab_size, d_model = 64, 128
    batch, seq = 2, 8

    # nn.Embedding default init: weight ~ N(0, 1)
    emb_table = jax.random.normal(k_emb, (vocab_size, d_model), dtype=jnp.float32)
    input_ids = jax.random.randint(k_ids, (batch, seq), 0, vocab_size,
                                   dtype=jnp.int32)

    ref = jnp.take(emb_table, input_ids, axis=0)

    # Path 1: small-vocab one-hot MXU path (default for this shape).
    out_mxu = jax.block_until_ready(word_embedding(input_ids, emb_table))
    assert out_mxu.shape == (batch, seq, d_model)
    assert jnp.allclose(out_mxu, ref)

    # Path 2: HBM-resident table + row-granular async-DMA gather (forced).
    out_dma = jax.block_until_ready(
        word_embedding(input_ids, emb_table, force_hbm_gather=True))
    assert out_dma.shape == (batch, seq, d_model)
    assert jnp.allclose(out_dma, ref)

    print("KERNEL_OK")
</pallas_src>

<mosaic_0001>
module attributes {stable_mosaic.version = 11 : i64} {
  func.func @_onehot_embed_kernel(%arg0: i32, %arg1: memref<16x1xi32, #tpu.memory_space<vmem>>, %arg2: memref<64x128xf32, #tpu.memory_space<vmem>>, %arg3: memref<16x128xf32, #tpu.memory_space<vmem>>) attributes {dimension_semantics = [#tpu.dimension_semantics<parallel>], iteration_bounds = array<i64: 1>, scalar_prefetch = 0 : i64, scratch_operands = 0 : i64, tpu.core_type = #tpu.core_type<tc>, window_params = [{transform_indices = @transform_0, window_bounds = array<i64: 16, 1>}, {pipeline_mode = #tpu.pipeline_mode<synchronous>, transform_indices = @transform_1, window_bounds = array<i64: 64, 128>}, {transform_indices = @transform_2, window_bounds = array<i64: 16, 128>}]} {
    %c0 = arith.constant 0 : index
    %c0_0 = arith.constant 0 : index
    %0 = vector.load %arg1[%c0, %c0_0] : memref<16x1xi32, #tpu.memory_space<vmem>>, vector<16x1xi32>
    %1 = tpu.iota {dimensions = array<i32: 1>} : vector<16x64xi32>
    %2 = vector.broadcast %0 : vector<16x1xi32> to vector<16x64xi32>
    %3 = arith.cmpi eq, %2, %1 : vector<16x64xi32>
    %4 = arith.extui %3 : vector<16x64xi1> to vector<16x64xi32>
    %5 = arith.sitofp %4 : vector<16x64xi32> to vector<16x64xf32>
    %c0_1 = arith.constant 0 : index
    %c0_2 = arith.constant 0 : index
    %6 = vector.load %arg2[%c0_1, %c0_2] : memref<64x128xf32, #tpu.memory_space<vmem>>, vector<64x128xf32>
    %cst = arith.constant dense<0.000000e+00> : vector<16x128xf32>
    %7 = tpu.matmul %5, %6, %cst {dimension_numbers = #tpu.dot_dimension_numbers<[1], [0], [0], [1], [0, 0, 1, 1], [], []>} : vector<16x64xf32>, vector<64x128xf32>, vector<16x128xf32> -> vector<16x128xf32>
    %c0_3 = arith.constant 0 : index
    %c0_4 = arith.constant 0 : index
    %8 = vector.load %arg3[%c0_3, %c0_4] : memref<16x128xf32, #tpu.memory_space<vmem>>, vector<16x128xf32>
    tpu.vector_store %arg3[%c0_3, %c0_4], %7 {strides = array<i32>} : memref<16x128xf32, #tpu.memory_space<vmem>>, vector<16x128xf32>,
    return
  }
  func.func @transform_0(%arg0: i32) -> (i32, i32) {
    %c0_i32 = arith.constant 0 : i32
    %c0_i32_0 = arith.constant 0 : i32
    return %arg0, %c0_i32 : i32, i32
  }
  func.func @transform_1(%arg0: i32) -> (i32, i32) {
    %c0_i32 = arith.constant 0 : i32
    %c0_i32_0 = arith.constant 0 : i32
    %c0_i32_1 = arith.constant 0 : i32
    return %c0_i32, %c0_i32_0 : i32, i32
  }
  func.func @transform_2(%arg0: i32) -> (i32, i32) {
    %c0_i32 = arith.constant 0 : i32
    %c0_i32_0 = arith.constant 0 : i32
    return %arg0, %c0_i32 : i32, i32
  }
}

</mosaic_0001>

<bundles_post_ra>
// kernel: tpu_custom_call.1
= control target key start
LH: loop header
LB: loop body
LE: loop exit
PB: predicated region body
PF: predicated region fallthrough
CT: control target
= control target key end

     0   :  { %7 = vsyncpa [#allocation3], 0  ;;  %s312_s0 = inlined_call_operand.vmem [shape: s32[16,1], index: 0, kind: input, shape index: {}]   ;;  %s313_s1 = inlined_call_operand.hbm [shape: f32[64,128], index: 1, kind: input, shape index: {}]   ;;  %s314_s2 = inlined_call_operand.hbm [shape: f32[16,128], index: 2, kind: output, shape index: {}]  }
   0x1   :  { %8 = vsyncpa [#allocation4], 0  ;;  %s255_s9 = smov [#allocation2]   ;;  %s207_s13 = scalar_lea.hbm %s313_s1, 1024 }
   0x2   :  { %s16_s10 = sshll.u32 %s255_s9, 4  ;;  %p208_p0 = scmp.ne.s32.totalorder %s313_s1, %s207_s13  ;;  %s17_s10 = int_to_ptr.vmem [resolvable:$true] %s16_s10 }
   0x3   :  { %p211_p1 = scmp.lt.u32.totalorder %s207_s13, %s313_s1 }
   0x5   :  { %p213_p2 = pnand %p211_p1, %p208_p0 }
   0x7   :  { %216 = shalt.err (!%p213_p2)
}
   0x8   :  { %s217_s18 = scalar_lea.vmem %s17_s10, 1024  ;;  %p222_p4 = scmp.lt.s32.totalorder %s17_s10, %s17_s10 }
   0x9   :  { %p218_p3 = scmp.ne.s32.totalorder %s17_s10, %s217_s18  ;;  %p223_p5 = scmp.lt.s32.totalorder %s217_s18, %s217_s18 }
   0xb   :  { %p224_p6 = por %p223_p5, %p222_p4 }
   0xd   :  { %p225_p7 = pnand %p224_p6, %p218_p3 }
   0xf   :  { %228 = shalt.err (!%p225_p7)
}
  0x10   :  { %s256_s19 = smov 128   ;;  %s257_s20 = smov 8  }
  0x11   :  { %22 = dma.hbm_to_vmem [thread:$0]  %s313_s1, 1024, %s17_s10, [#allocation3], %s256_s19, %s256_s19, %s257_s20  }
  0x12   :  { %251 = dma.done.wait [#allocation3], 1024  }
  0x13   :  { %252 = vsyncadd [#allocation3], 4294966272  ;;  %v258_v0 = vmov 0   ;;  %v26_v1 = vld [vmem:[%s312_s0] sm:$0xff]  ;;  %v43_v3 = vld [vmem:[#allocation2 + $0x8] sm:$0xff]  ;;  %v28_v15 = vlaneseq  ;;  %vm50_vm0 = vcmask 523264  }
  0x14   :  { %206 = vset.pattern.permute.xlu0 %v258_v0  ;;  %v42_v2 = vld [vmem:[#allocation2] sm:$0xff]  ;;  %v44_v4 = vld [vmem:[#allocation2 + $0x10] sm:$0xff]  ;;  %v45_v5 = vld [vmem:[#allocation2 + $0x18] sm:$0xff]  ;;  %v259_v18 = vmov 0.0  }
  0x15   :  { %31 = vperm.xlu0 %206, %v26_v1   ;;  %v27_v6 = vld [vmem:[%s312_s0 + $0x8] sm:$0xff]  ;;  %v184_v7 = vpack.c.bf16 %v43_v3, %v42_v2  ;;  %v188_v8 = vpack.c.bf16 %v45_v5, %v44_v4  ;;  %v46_v9 = vld [vmem:[#allocation2 + $0x20] sm:$0xff]  ;;  %v48_v12 = vld [vmem:[#allocation2 + $0x30] sm:$0xff]  ;;  %v29_v16 = vand.u32 127, %v28_v15  ;;  %s260_s0 = smov [#allocation5]  }
  0x16   :  { %v47_v10 = vld [vmem:[#allocation2 + $0x28] sm:$0xff]  ;;  %v49_v13 = vld [vmem:[#allocation2 + $0x38] sm:$0xff]  ;;  %s139_s1 = sshll.u32 %s260_s0, 4  ;;  %s140_s1 = int_to_ptr.vmem [resolvable:$true] %s139_s1 }
  0x17   :  { %185 = vmatprep.subr.bf16.mxu0 %v184_v7  ;;  %v192_v11 = vpack.c.bf16 %v47_v10, %v46_v9  ;;  %v196_v14 = vpack.c.bf16 %v49_v13, %v48_v12  ;;  %s229_s27 = scalar_lea.vmem %s140_s1, 256  ;;  %p234_p9 = scmp.lt.s32.totalorder %s140_s1, %s140_s1 }
  0x18   :  { %187 = vmatpush3.bf16.msra.mxu0 %v184_v7  ;;  %p230_p8 = scmp.ne.s32.totalorder %s140_s1, %s229_s27  ;;  %p235_p10 = scmp.lt.s32.totalorder %s229_s27, %s229_s27 }
  0x19   :  { %34 = vperm.xlu0 %206, %v27_v6   ;;  %189 = vmatprep.subr.bf16.mxu0 %v188_v8 }
  0x1a   :  { %p236_p11 = por %p235_p10, %p234_p9 }
  0x1c   :  { %191 = vmatpush3.bf16.msra.mxu0 %v188_v8  ;;  %p237_p12 = pnand %p236_p11, %p230_p8 }
  0x1d   :  { %193 = vmatprep.subr.bf16.mxu0 %v192_v11 }
  0x20   :  { %195 = vmatpush3.bf16.msra.mxu0 %v192_v11 }
  0x21   :  { %197 = vmatprep.subr.bf16.mxu0 %v196_v14 }
  0x24   :  { %199 = vmatpush3.bf16.msra.mxu0 %v196_v14 }
  0x94   :  { %v32_v17 = vpop.permute.xlu0 %31 }
  0x95   :  { %vm36_vm1 = vcmp.eq.s32.totalorder %v32_v17, %v29_v16 }
  0x96   :  { %v151_v19 = vsel %vm36_vm1, 1.0, %v259_v18 }
  0x97   :  { %181 = vmatprep.mubr.msk.f32.mxu0 %vm50_vm0, %v151_v19 }
  0x98   :  { %v35_v20 = vpop.permute.xlu0 %34 }
  0x99   :  { %vm37_vm2 = vcmp.eq.s32.totalorder %v35_v20, %v29_v16 }
  0x9a   :  { %v152_v21 = vsel %vm37_vm2, 1.0, %v259_v18 }
  0x9b   :  { %182 = vmatmul.mubr.msk.f32.vlgmr.msra.gmra.mrb[0].mxu0 %vm50_vm0, %v152_v21 }
 0x16e   :  { %v183_v22 = vpop.f32.mrb[0].mxu0 }
 0x16f   :  { %133 = vst [vmem:[#allocation5 + $0x8] sm:$0xff] %v183_v22  ;;  %v123_v23 = vpop.f32.mrb[1].mxu0 }
 0x170   :  { %132 = vst [vmem:[#allocation5] sm:$0xff] %v123_v23 }
 0x171   :  { %240 = shalt.err (!%p237_p12)
}
 0x172   :  { %s241_s30 = scalar_lea.hbm %s314_s2, 256 }
 0x173   :  { %p242_p13 = scmp.ne.s32.totalorder %s314_s2, %s241_s30  ;;  %p245_p0 = scmp.lt.u32.totalorder %s241_s30, %s314_s2 }
 0x175   :  { %p247_p1 = pnand %p245_p0, %p242_p13 }
 0x177   :  { %250 = shalt.err (!%p247_p1)
}
 0x178   :  { %145 = dma.vmem_to_hbm [thread:$0]  %s140_s1, 256, %s314_s2, [#allocation4], %s256_s19, %s256_s19, %s257_s20  }
 0x179   :  { %253 = dma.done.wait [#allocation4], 256  }
 0x17a   :  { %254 = vsyncadd [#allocation4], 4294967040 }
 0x17b   :  { %149 = vsyncpa [#allocation3], 1 }
 0x17c   :  { %150 = vsyncpa [#allocation4], 1 }

</bundles_post_ra>
